<compile_context>
chip_gen: v6e
topology: v6e:2x2x1
jax: 0.10.0
libtpu: 0.0.40
codegen_flags: <defaults>
</compile_context>

<pallas_src>
import functools

import jax
import jax.numpy as jnp
from jax.experimental import pallas as pl
from jax.experimental.pallas import tpu as pltpu


def _encoder_kernel(xT_ref, w1_ref, b1_ref, w2_ref, b2_ref, w3_ref, b3_ref, o_ref):
    # xT_ref: (N, tb) bf16, weights (out, in) bf16, biases (out, 1) f32.
    xT = xT_ref[...]                                                    # (N, tb)
    h1 = jnp.tanh(
        jnp.dot(w1_ref[...], xT, preferred_element_type=jnp.float32) + b1_ref[...]
    )                                                                   # (H, tb) f32
    h2 = jnp.tanh(
        jnp.dot(w2_ref[...], h1.astype(w2_ref.dtype),
                preferred_element_type=jnp.float32) + b2_ref[...]
    )                                                                   # (H, tb) f32
    o_ref[...] = (
        jnp.dot(w3_ref[...], h2.astype(w3_ref.dtype),
                preferred_element_type=jnp.float32) + b3_ref[...]
    )                                                                   # (b, tb) f32


def _choose_tile(B, max_tb=512):
    """Pick (tb, B_pad) with tb on the lane axis.

    Small batches: one tile covering the whole (unpadded) batch (legal since the
    tile's lane dim equals the full array dim).  Larger batches: lane-dense
    multiple-of-128 tiles capped at max_tb, sized so the parallel grid has >= 2
    steps (feeds both v7x TensorCores; harmless on v5e/v6e).
    """
    if B <= 256:
        return B, B
    tb = min(max_tb, max(128, ((B + 1) // 2) // 128 * 128))
    B_pad = pl.cdiv(B, tb) * tb
    return tb, B_pad


@functools.partial(jax.jit, static_argnames=("max_tb",))
def encoder_forward(x_flat, w1, b1, w2, b2, w3, b3, max_tb=512):
    """x_flat: (B, N) float32.  Returns (B, 1, b) float32 (matches x.view(-1,1,N))."""
    B, N = x_flat.shape
    H = w1.shape[0]
    b_out = w3.shape[0]

    tb, B_pad = _choose_tile(B, max_tb)

    # Batch on lanes: work on x^T.  Cast to bf16 first so the transpose/pad pass
    # and the kernel's HBM read stream are half-width.
    xT = x_flat.astype(jnp.bfloat16).T                                  # (N, B)
    if B_pad != B:
        # Only triggers for large, non-multiple-of-tile batches; XLA fuses the
        # pad with the transpose so it is a single extra pass at worst.
        xT = jnp.pad(xT, ((0, 0), (0, B_pad - B)))

    w1b = w1.astype(jnp.bfloat16)
    w2b = w2.astype(jnp.bfloat16)
    w3b = w3.astype(jnp.bfloat16)

    grid = (B_pad // tb,)

    outT = pl.pallas_call(
        _encoder_kernel,
        out_shape=jax.ShapeDtypeStruct((b_out, B_pad), jnp.float32),
        grid_spec=pltpu.PrefetchScalarGridSpec(
            num_scalar_prefetch=0,
            grid=grid,
            in_specs=[
                pl.BlockSpec((N, tb), lambda i: (0, i)),      # x^T tile (streamed)
                pl.BlockSpec((H, N), lambda i: (0, 0)),       # w1 (VMEM-resident)
                pl.BlockSpec((H, 1), lambda i: (0, 0)),       # b1
                pl.BlockSpec((H, H), lambda i: (0, 0)),       # w2
                pl.BlockSpec((H, 1), lambda i: (0, 0)),       # b2
                pl.BlockSpec((b_out, H), lambda i: (0, 0)),   # w3
                pl.BlockSpec((b_out, 1), lambda i: (0, 0)),   # b3
            ],
            out_specs=pl.BlockSpec((b_out, tb), lambda i: (0, i)),
        ),
        compiler_params=pltpu.CompilerParams(
            dimension_semantics=("parallel",),
        ),
    )(xT, w1b, b1, w2b, b2, w3b, b3)

    out = outT[:, :B].T                                                 # (B, b_out)
    return out.reshape(B, 1, b_out)


def xavier_normal(key, fan_out, fan_in, dtype=jnp.float32):
    # nn.init.xavier_normal_: std = sqrt(2 / (fan_in + fan_out)); PyTorch layout (out, in).
    std = (2.0 / (fan_in + fan_out)) ** 0.5
    return std * jax.random.normal(key, (fan_out, fan_in), dtype=dtype)


def init_encoder_params(key, m, n, b, alpha=1):
    N = m * n
    H = 16 * alpha
    k1, k2, k3 = jax.random.split(key, 3)
    w1 = xavier_normal(k1, H, N)
    b1 = jnp.zeros((H, 1), jnp.float32)
    w2 = xavier_normal(k2, H, H)
    b2 = jnp.zeros((H, 1), jnp.float32)
    w3 = xavier_normal(k3, b, H)
    b3 = jnp.zeros((b, 1), jnp.float32)
    return w1, b1, w2, b2, w3, b3


def _reference_bf16(x_flat, w1, b1, w2, b2, w3, b3):
    # Pure-JAX reference with the same bf16-matmul / f32-accumulate recipe.
    xb = x_flat.astype(jnp.bfloat16)
    h1 = jnp.tanh(jnp.dot(xb, w1.astype(jnp.bfloat16).T,
                          preferred_element_type=jnp.float32) + b1.T)
    h2 = jnp.tanh(jnp.dot(h1.astype(jnp.bfloat16), w2.astype(jnp.bfloat16).T,
                          preferred_element_type=jnp.float32) + b2.T)
    return jnp.dot(h2.astype(jnp.bfloat16), w3.astype(jnp.bfloat16).T,
                   preferred_element_type=jnp.float32) + b3.T


def _reference_f32(x_flat, w1, b1, w2, b2, w3, b3):
    h1 = jnp.tanh(x_flat @ w1.T + b1.T)
    h2 = jnp.tanh(h1 @ w2.T + b2.T)
    return h2 @ w3.T + b3.T


if __name__ == "__main__":
    # Shapes consistent with the module: m=4, n=8 -> N=32, ALPHA=1 -> H=16, b=8.
    m, n, b_dim, alpha = 4, 8, 8, 1
    N = m * n
    batch = 2

    key = jax.random.PRNGKey(0)
    kx, kx2, kp = jax.random.split(key, 3)

    params = init_encoder_params(kp, m, n, b_dim, alpha)
    w1, b1, w2, b2, w3, b3 = params

    # --- Small batch (single-tile path), mirrors x.view(-1, 1, N). ---
    x = jax.random.normal(kx, (batch, m, n), dtype=jnp.float32)
    x_flat = x.reshape(-1, N)
    out = jax.block_until_ready(encoder_forward(x_flat, *params))
    assert out.shape == (batch, 1, b_dim)

    ref_bf16 = _reference_bf16(x_flat, *params).reshape(batch, 1, b_dim)
    ref_f32 = _reference_f32(x_flat, *params).reshape(batch, 1, b_dim)
    assert jnp.allclose(out, ref_bf16, atol=1e-4, rtol=1e-4)
    assert jnp.allclose(out, ref_f32, atol=1e-1, rtol=1e-1)   # bf16 vs f32 module

    # --- Larger batch (multi-step lane-dense tiled path, with padding). ---
    batch2 = 700
    x2 = jax.random.normal(kx2, (batch2, N), dtype=jnp.float32)
    out2 = jax.block_until_ready(encoder_forward(x2, *params))
    assert out2.shape == (batch2, 1, b_dim)
    ref2 = _reference_bf16(x2, *params).reshape(batch2, 1, b_dim)
    assert jnp.allclose(out2, ref2, atol=1e-4, rtol=1e-4)

    print("KERNEL_OK")
</pallas_src>

<mosaic_0001>
module attributes {stable_mosaic.version = 11 : i64} {
  func.func @_encoder_kernel(%arg0: i32, %arg1: memref<32x2xbf16, #tpu.memory_space<vmem>>, %arg2: memref<16x32xbf16, #tpu.memory_space<vmem>>, %arg3: memref<16x1xf32, #tpu.memory_space<vmem>>, %arg4: memref<16x16xbf16, #tpu.memory_space<vmem>>, %arg5: memref<16x1xf32, #tpu.memory_space<vmem>>, %arg6: memref<8x16xbf16, #tpu.memory_space<vmem>>, %arg7: memref<8x1xf32, #tpu.memory_space<vmem>>, %arg8: memref<8x2xf32, #tpu.memory_space<vmem>>) attributes {dimension_semantics = [#tpu.dimension_semantics<parallel>], iteration_bounds = array<i64: 1>, scalar_prefetch = 0 : i64, scratch_operands = 0 : i64, tpu.core_type = #tpu.core_type<tc>, window_params = [{transform_indices = @transform_0, window_bounds = array<i64: 32, 2>}, {pipeline_mode = #tpu.pipeline_mode<synchronous>, transform_indices = @transform_1, window_bounds = array<i64: 16, 32>}, {pipeline_mode = #tpu.pipeline_mode<synchronous>, transform_indices = @transform_2, window_bounds = array<i64: 16, 1>}, {pipeline_mode = #tpu.pipeline_mode<synchronous>, transform_indices = @transform_3, window_bounds = array<i64: 16, 16>}, {pipeline_mode = #tpu.pipeline_mode<synchronous>, transform_indices = @transform_4, window_bounds = array<i64: 16, 1>}, {pipeline_mode = #tpu.pipeline_mode<synchronous>, transform_indices = @transform_5, window_bounds = array<i64: 8, 16>}, {pipeline_mode = #tpu.pipeline_mode<synchronous>, transform_indices = @transform_6, window_bounds = array<i64: 8, 1>}, {transform_indices = @transform_7, window_bounds = array<i64: 8, 2>}]} {
    %c0 = arith.constant 0 : index
    %c0_0 = arith.constant 0 : index
    %0 = vector.load %arg1[%c0, %c0_0] : memref<32x2xbf16, #tpu.memory_space<vmem>>, vector<32x2xbf16>
    %c0_1 = arith.constant 0 : index
    %c0_2 = arith.constant 0 : index
    %1 = vector.load %arg2[%c0_1, %c0_2] : memref<16x32xbf16, #tpu.memory_space<vmem>>, vector<16x32xbf16>
    %cst = arith.constant dense<0.000000e+00> : vector<16x2xf32>
    %2 = tpu.matmul %1, %0, %cst {dimension_numbers = #tpu.dot_dimension_numbers<[1], [0], [0], [1], [0, 0, 1, 1], [], []>} : vector<16x32xbf16>, vector<32x2xbf16>, vector<16x2xf32> -> vector<16x2xf32>
    %c0_3 = arith.constant 0 : index
    %c0_4 = arith.constant 0 : index
    %3 = vector.load %arg3[%c0_3, %c0_4] : memref<16x1xf32, #tpu.memory_space<vmem>>, vector<16x1xf32>
    %4 = vector.broadcast %3 : vector<16x1xf32> to vector<16x2xf32>
    %5 = arith.addf %2, %4 : vector<16x2xf32>
    %6 = math.tanh %5 : vector<16x2xf32>
    %c0_5 = arith.constant 0 : index
    %c0_6 = arith.constant 0 : index
    %7 = vector.load %arg4[%c0_5, %c0_6] : memref<16x16xbf16, #tpu.memory_space<vmem>>, vector<16x16xbf16>
    %8 = arith.truncf %6 : vector<16x2xf32> to vector<16x2xbf16>
    %cst_7 = arith.constant dense<0.000000e+00> : vector<16x2xf32>
    %9 = tpu.matmul %7, %8, %cst_7 {dimension_numbers = #tpu.dot_dimension_numbers<[1], [0], [0], [1], [0, 0, 1, 1], [], []>} : vector<16x16xbf16>, vector<16x2xbf16>, vector<16x2xf32> -> vector<16x2xf32>
    %c0_8 = arith.constant 0 : index
    %c0_9 = arith.constant 0 : index
    %10 = vector.load %arg5[%c0_8, %c0_9] : memref<16x1xf32, #tpu.memory_space<vmem>>, vector<16x1xf32>
    %11 = vector.broadcast %10 : vector<16x1xf32> to vector<16x2xf32>
    %12 = arith.addf %9, %11 : vector<16x2xf32>
    %13 = math.tanh %12 : vector<16x2xf32>
    %c0_10 = arith.constant 0 : index
    %c0_11 = arith.constant 0 : index
    %14 = vector.load %arg6[%c0_10, %c0_11] : memref<8x16xbf16, #tpu.memory_space<vmem>>, vector<8x16xbf16>
    %15 = arith.truncf %13 : vector<16x2xf32> to vector<16x2xbf16>
    %cst_12 = arith.constant dense<0.000000e+00> : vector<8x2xf32>
    %16 = tpu.matmul %14, %15, %cst_12 {dimension_numbers = #tpu.dot_dimension_numbers<[1], [0], [0], [1], [0, 0, 1, 1], [], []>} : vector<8x16xbf16>, vector<16x2xbf16>, vector<8x2xf32> -> vector<8x2xf32>
    %c0_13 = arith.constant 0 : index
    %c0_14 = arith.constant 0 : index
    %17 = vector.load %arg7[%c0_13, %c0_14] : memref<8x1xf32, #tpu.memory_space<vmem>>, vector<8x1xf32>
    %18 = vector.broadcast %17 : vector<8x1xf32> to vector<8x2xf32>
    %19 = arith.addf %16, %18 : vector<8x2xf32>
    %c0_15 = arith.constant 0 : index
    %c0_16 = arith.constant 0 : index
    %20 = vector.load %arg8[%c0_15, %c0_16] : memref<8x2xf32, #tpu.memory_space<vmem>>, vector<8x2xf32>
    tpu.vector_store %arg8[%c0_15, %c0_16], %19 {strides = array<i32>} : memref<8x2xf32, #tpu.memory_space<vmem>>, vector<8x2xf32>,
    return
  }
  func.func @transform_0(%arg0: i32) -> (i32, i32) {
    %c0_i32 = arith.constant 0 : i32
    %c0_i32_0 = arith.constant 0 : i32
    return %c0_i32, %arg0 : i32, i32
  }
  func.func @transform_1(%arg0: i32) -> (i32, i32) {
    %c0_i32 = arith.constant 0 : i32
    %c0_i32_0 = arith.constant 0 : i32
    %c0_i32_1 = arith.constant 0 : i32
    return %c0_i32, %c0_i32_0 : i32, i32
  }
  func.func @transform_2(%arg0: i32) -> (i32, i32) {
    %c0_i32 = arith.constant 0 : i32
    %c0_i32_0 = arith.constant 0 : i32
    %c0_i32_1 = arith.constant 0 : i32
    return %c0_i32, %c0_i32_0 : i32, i32
  }
  func.func @transform_3(%arg0: i32) -> (i32, i32) {
    %c0_i32 = arith.constant 0 : i32
    %c0_i32_0 = arith.constant 0 : i32
    %c0_i32_1 = arith.constant 0 : i32
    return %c0_i32, %c0_i32_0 : i32, i32
  }
  func.func @transform_4(%arg0: i32) -> (i32, i32) {
    %c0_i32 = arith.constant 0 : i32
    %c0_i32_0 = arith.constant 0 : i32
    %c0_i32_1 = arith.constant 0 : i32
    return %c0_i32, %c0_i32_0 : i32, i32
  }
  func.func @transform_5(%arg0: i32) -> (i32, i32) {
    %c0_i32 = arith.constant 0 : i32
    %c0_i32_0 = arith.constant 0 : i32
    %c0_i32_1 = arith.constant 0 : i32
    return %c0_i32, %c0_i32_0 : i32, i32
  }
  func.func @transform_6(%arg0: i32) -> (i32, i32) {
    %c0_i32 = arith.constant 0 : i32
    %c0_i32_0 = arith.constant 0 : i32
    %c0_i32_1 = arith.constant 0 : i32
    return %c0_i32, %c0_i32_0 : i32, i32
  }
  func.func @transform_7(%arg0: i32) -> (i32, i32) {
    %c0_i32 = arith.constant 0 : i32
    %c0_i32_0 = arith.constant 0 : i32
    return %c0_i32, %arg0 : i32, i32
  }
}

</mosaic_0001>

<bundles_post_ra>
// kernel: encoder_forward.1
= control target key start
LH: loop header
LB: loop body
LE: loop exit
PB: predicated region body
PF: predicated region fallthrough
CT: control target
= control target key end

     0   :  { %v284_v0 = vmov 0.0   ;;  %vm285_vm0 = vmmov 0   ;;  %v286_v2 = vmov 0   ;;  %vm62_vm1 = vcmask 261120   ;;  %s365_s0 = inlined_call_operand.vmem [shape: bf16[32,2], index: 0, kind: input, shape index: {}]   ;;  %s366_s2 = inlined_call_operand.vmem [shape: f32[16,1], index: 2, kind: input, shape index: {}]   ;;  %s367_s1 = inlined_call_operand.vmem [shape: bf16[16,32], index: 1, kind: input, shape index: {}]   ;;  %s368_s6 = inlined_call_operand.vmem [shape: f32[8,1], index: 6, kind: input, shape index: {}]   ;;  %s369_s3 = inlined_call_operand.vmem [shape: bf16[16,16], index: 3, kind: input, shape index: {}]   ;;  %s370_s4 = inlined_call_operand.vmem [shape: f32[16,1], index: 4, kind: input, shape index: {}]   ;;  %s371_s5 = inlined_call_operand.vmem [shape: bf16[8,16], index: 5, kind: input, shape index: {}]   ;;  %s372_s7 = inlined_call_operand.vmem [shape: f32[8,2], index: 7, kind: output, shape index: {}]  }
   0x1   :  { %247 = vmatprep.subr.bf16.mxu0 %v284_v0  ;;  %v272_v1 = vld [vmem:[%s365_s0 + $0x8] sm:$0xff]   ;;  %251 = vmatprep.mubr.msk.bf16.mxu0 %vm285_vm0, %v284_v0  ;;  %v273_v3 = vld [vmem:[%s365_s0] sm:$0xff]   ;;  %vm129_vm2 = vcmask 130048   ;;  %vm227_vm3 = vcmask 15360  }
   0x2   :  { %270 = vset.pattern.permute.xlu0 %v286_v2  ;;  %255 = vmatprep.subr.bf16.mxu1 %v284_v0  ;;  %v33_v4 = vld [vmem:[%s366_s2] sm:$0xff]  ;;  %v34_v6 = vld [vmem:[%s366_s2 + $0x8] sm:$0xff] }
   0x3   :  { %248 = vmatpush3.bf16.msra.mxu0 %v272_v1  ;;  %257 = vmatprep.mubr.msk.bf16.mxu1 %vm285_vm0, %v284_v0  ;;  %v274_v5 = vld [vmem:[%s367_s1] sm:$0xff]   ;;  %v113_v9 = vld [vmem:[%s370_s4 + $0x8] sm:$0xff] }
   0x4   :  { %249 = vmatprep.subr.bf16.mxu0 %v284_v0  ;;  %271 = vset.pattern.permute.xlu1 %v286_v2  ;;  %v178_v7 = vld [vmem:[%s368_s6] sm:$0xff] }
   0x5   :  { %37 = vperm.xlu0 %270, %v33_v4   ;;  %v112_v8 = vld [vmem:[%s370_s4] sm:$0xff] }
   0x6   :  { %116 = vperm.xlu1 %271, %v112_v8   ;;  %v275_v21 = vld [vmem:[%s369_s3] sm:$0xff]  }
   0x7   :  { %250 = vmatpush3.bf16.msra.mxu0 %v273_v3  ;;  %v176_v33 = vld [vmem:[%s371_s5] sm:$0xf] }
   0x9   :  { %42 = vperm.xlu0 %270, %v34_v6  }
   0xa   :  { %252 = vmatmul.mubr.msk.bf16.vlgmr.msra.gmra.mxu0 %vm62_vm1, %v274_v5  ;;  %121 = vperm.xlu1 %271, %v113_v9  }
   0xd   :  { %181 = vperm.xlu0 %270, %v178_v7  }
  0x80   :  { %v38_v10 = vpop.permute.xlu0 %37 }
  0x81   :  { %v117_v22 = vpop.permute.xlu1 %116 }
  0x84   :  { %v43_v14 = vpop.permute.xlu0 %42 }
  0x85   :  { %v122_v26 = vpop.permute.xlu1 %121 }
  0x88   :  { %v182_v34 = vpop.permute.xlu0 %181 }
  0xca   :  { %v100_v11 = vpop.f32.mrf.mxu0 }
  0xcb   :  { %v101_v12 = vadd.f32 %v100_v11, %v38_v10 }
  0xcc   :  { %v253_v13 = vpop.f32.mrf.mxu0 }
  0xcd   :  { %276 = vtanh.f32 %v101_v12 }
  0xce   :  { %v103_v15 = vpop.f32.mrf.mxu0 }
  0xcf   :  { %v104_v16 = vadd.f32 %v103_v15, %v43_v14 }
  0xd0   :  { %v254_v17 = vpop.f32.mrf.mxu0 }
  0xd1   :  { %278 = vtanh.f32 %v104_v16 }
  0xda   :  { %v277_v18 = vpop.eup %276 }
  0xde   :  { %v279_v19 = vpop.eup %278 }
  0xdf   :  { %v111_v20 = vpack.c.bf16 %v279_v19, %v277_v18 }
  0xe1   :  { %256 = vmatpush3.bf16.msra.mxu1 %v111_v20 }
  0xe2   :  { %261 = vmatprep.subr.bf16.mxu1 %v284_v0 }
  0xe4   :  { %258 = vmatmul.mubr.msk.bf16.vlgmr.msra.gmra.mxu1 %vm129_vm2, %v275_v21 }
  0xe5   :  { %263 = vmatprep.mubr.msk.bf16.mxu1 %vm285_vm0, %v284_v0 }
 0x1a4   :  { %v167_v23 = vpop.f32.mrf.mxu1 }
 0x1a5   :  { %v168_v24 = vadd.f32 %v167_v23, %v117_v22 }
 0x1a6   :  { %v259_v25 = vpop.f32.mrf.mxu1 }
 0x1a7   :  { %280 = vtanh.f32 %v168_v24 }
 0x1a8   :  { %v170_v27 = vpop.f32.mrf.mxu1 }
 0x1a9   :  { %v171_v28 = vadd.f32 %v170_v27, %v122_v26 }
 0x1aa   :  { %v260_v29 = vpop.f32.mrf.mxu1 }
 0x1ab   :  { %282 = vtanh.f32 %v171_v28 }
 0x1b4   :  { %v281_v30 = vpop.eup %280 }
 0x1b8   :  { %v283_v31 = vpop.eup %282 }
 0x1b9   :  { %v177_v32 = vpack.c.bf16 %v283_v31, %v281_v30 }
 0x1bb   :  { %262 = vmatpush3.bf16.msra.mxu1 %v177_v32 }
 0x1be   :  { %264 = vmatmul.mubr.msk.bf16.vlgmr.msra.gmra.mxu1 %vm129_vm2, %v176_v33 }
 0x27e   :  { %v221_v35 = vpop.f32.mrf.mxu1 }
 0x27f   :  { %v222_v36 = vadd.f32 %v221_v35, %v182_v34 }
 0x280   :  { %v265_v37 = vpop.f32.mrf.mxu1 }
 0x281   :  { %228 = vst.msk [vmem:[%s372_s7] sm:$0xff] %vm227_vm3, %v222_v36 }
 0x282   :  { %v224_v38 = vpop.f32.mrf.mxu1 }
 0x284   :  { %v266_v39 = vpop.f32.mrf.mxu1 }

</bundles_post_ra>
